<compile_context>
chip_gen: v6e
topology: v6e:2x2x1
jax: 0.10.0
libtpu: 0.0.40
codegen_flags: <defaults>
</compile_context>

<pallas_src>
import functools

import jax
import jax.numpy as jnp
from jax.experimental import pallas as pl
from jax.experimental.pallas import tpu as pltpu  # noqa: F401  (TPU backend)

_LANE = 128  # TPU vreg lane width; pad the concatenated output dim to this.


def _apply_act(y, act: str):
    if act == "relu":
        return jnp.maximum(y, 0.0)
    if act == "sigmoid":
        return jax.nn.sigmoid(y)
    if act == "softmax":
        m = jnp.max(y, axis=-1, keepdims=True)
        e = jnp.exp(y - m)
        # approx reciprocal lowers to the EUP (vrcp) slot, otherwise idle here.
        return e * pl.reciprocal(jnp.sum(e, axis=-1, keepdims=True), approx=True)
    if act == "none":
        return y
    raise ValueError(f"unknown activation: {act}")


def _fused_heads_kernel(x_ref, w_ref, b_ref, o_ref, *, acts, offsets, out_pad):
    # One wide matmul on the MXU: (B, K) @ (K, out_pad), f32 accumulation.
    y = jnp.dot(x_ref[...], w_ref[...], preferred_element_type=jnp.float32)
    y = y + b_ref[...]  # (1, out_pad) broadcast over batch

    # Apply each head's activation to its static lane-slice, then emit one
    # lane-dense (multiple-of-128) store instead of three masked 32-lane ones.
    pieces = []
    for m, act in enumerate(acts):
        lo, hi = offsets[m], offsets[m + 1]
        pieces.append(_apply_act(y[:, lo:hi], act))
    used = offsets[-1]
    if used < out_pad:
        pieces.append(jnp.zeros((y.shape[0], out_pad - used), dtype=y.dtype))
    o_ref[...] = jnp.concatenate(pieces, axis=1).astype(o_ref.dtype)


def wrapped_multi_model_list(x, params):
    """Equivalent of WrappedMultiModelList.forward: returns a list of outputs.

    params: list of (w [in_f, out_f], b [out_f], act_name) per base model.
    All heads are evaluated inside one fused Pallas kernel.
    """
    batch, in_f = x.shape
    acts = tuple(act for (_, _, act) in params)

    # Per-model column offsets inside the concatenated output.
    offsets = [0]
    for (w, _, _) in params:
        assert w.shape[0] == in_f
        offsets.append(offsets[-1] + w.shape[1])
    total = offsets[-1]
    out_pad = ((total + _LANE - 1) // _LANE) * _LANE  # lane-dense output width

    # Pack weights / biases lane-dense (padding columns are zero; they are
    # never read back — each activation only touches its own slice).
    w_cat = jnp.zeros((in_f, out_pad), dtype=x.dtype)
    b_cat = jnp.zeros((1, out_pad), dtype=x.dtype)
    for (w, b, _), lo, hi in zip(params, offsets[:-1], offsets[1:]):
        w_cat = w_cat.at[:, lo:hi].set(w.astype(x.dtype))
        b_cat = b_cat.at[:, lo:hi].set(b.reshape(1, -1).astype(x.dtype))

    kernel = functools.partial(
        _fused_heads_kernel, acts=acts, offsets=tuple(offsets), out_pad=out_pad
    )
    y = pl.pallas_call(
        kernel,
        out_shape=jax.ShapeDtypeStruct((batch, out_pad), x.dtype),
        # No grid: the whole problem is a single VMEM tile.  Full-array blocks
        # are exempt from the (8,128) divisibility rule; index maps take no
        # grid args (written variadic for safety).
        in_specs=[
            pl.BlockSpec((batch, in_f), lambda *_: (0, 0)),
            pl.BlockSpec((in_f, out_pad), lambda *_: (0, 0)),
            pl.BlockSpec((1, out_pad), lambda *_: (0, 0)),
        ],
        out_specs=pl.BlockSpec((batch, out_pad), lambda *_: (0, 0)),
    )(x, w_cat, b_cat)

    # Slice the per-model outputs back out (cheap XLA slices in the wrapper).
    return [y[:, lo:hi] for lo, hi in zip(offsets[:-1], offsets[1:])]


def _ref_forward(x, params):
    outs = []
    for (w, b, act) in params:
        y = x @ w + b
        if act == "relu":
            y = jnp.maximum(y, 0.0)
        elif act == "sigmoid":
            y = jax.nn.sigmoid(y)
        elif act == "softmax":
            y = jax.nn.softmax(y, axis=-1)
        outs.append(y)
    return outs


if __name__ == "__main__":
    key = jax.random.PRNGKey(0)

    batch, in_f, out_f = 8, 32, 32
    acts = ["relu", "sigmoid", "softmax"]

    kx, *kps = jax.random.split(key, 1 + 2 * len(acts))
    x = jax.random.normal(kx, (batch, in_f), dtype=jnp.float32)

    params = []
    for i, act in enumerate(acts):
        kw, kb = kps[2 * i], kps[2 * i + 1]
        w = jax.random.normal(kw, (in_f, out_f), dtype=jnp.float32) * 0.1
        b = jax.random.normal(kb, (out_f,), dtype=jnp.float32) * 0.1
        params.append((w, b, act))

    outs = wrapped_multi_model_list(x, params)
    outs = [jax.block_until_ready(o) for o in outs]

    refs = _ref_forward(x, params)
    for o, r in zip(outs, refs):
        assert o.shape == r.shape and o.dtype == r.dtype
        # tolerance covers the approx (EUP) reciprocal in the softmax denom
        assert jnp.max(jnp.abs(o - r)) < 2e-3
    print("KERNEL_OK")
</pallas_src>

<mosaic_0001>
module attributes {stable_mosaic.version = 11 : i64} {
  func.func @_fused_heads_kernel(%arg0: memref<8x32xf32, #tpu.memory_space<vmem>>, %arg1: memref<32x128xf32, #tpu.memory_space<vmem>>, %arg2: memref<1x128xf32, #tpu.memory_space<vmem>>, %arg3: memref<8x128xf32, #tpu.memory_space<vmem>>) attributes {dimension_semantics = [], scalar_prefetch = 0 : i64, scratch_operands = 0 : i64, tpu.core_type = #tpu.core_type<tc>} {
    %c0 = arith.constant 0 : index
    %c0_0 = arith.constant 0 : index
    %0 = vector.load %arg0[%c0, %c0_0] : memref<8x32xf32, #tpu.memory_space<vmem>>, vector<8x32xf32>
    %c0_1 = arith.constant 0 : index
    %c0_2 = arith.constant 0 : index
    %1 = vector.load %arg1[%c0_1, %c0_2] : memref<32x128xf32, #tpu.memory_space<vmem>>, vector<32x128xf32>
    %cst = arith.constant dense<0.000000e+00> : vector<8x128xf32>
    %2 = tpu.matmul %0, %1, %cst {dimension_numbers = #tpu.dot_dimension_numbers<[1], [0], [0], [1], [0, 0, 1, 1], [], []>} : vector<8x32xf32>, vector<32x128xf32>, vector<8x128xf32> -> vector<8x128xf32>
    %c0_3 = arith.constant 0 : index
    %c0_4 = arith.constant 0 : index
    %3 = vector.load %arg2[%c0_3, %c0_4] : memref<1x128xf32, #tpu.memory_space<vmem>>, vector<1x128xf32>
    %4 = vector.broadcast %3 : vector<1x128xf32> to vector<8x128xf32>
    %5 = arith.addf %2, %4 : vector<8x128xf32>
    %6 = vector.extract_strided_slice %5 {offsets = [0, 0], sizes = [8, 32], strides = [1, 1]} : vector<8x128xf32> to vector<8x32xf32>
    %cst_5 = arith.constant 0.000000e+00 : f32
    %7 = vector.broadcast %cst_5 : f32 to vector<8x32xf32>
    %8 = arith.maximumf %6, %7 : vector<8x32xf32>
    %9 = vector.extract_strided_slice %5 {offsets = [0, 32], sizes = [8, 32], strides = [1, 1]} : vector<8x128xf32> to vector<8x32xf32>
    %10 = arith.negf %9 : vector<8x32xf32>
    %11 = math.exp %10 : vector<8x32xf32>
    %cst_6 = arith.constant 1.000000e+00 : f32
    %12 = vector.broadcast %cst_6 : f32 to vector<8x32xf32>
    %13 = arith.addf %12, %11 : vector<8x32xf32>
    %14 = arith.divf %12, %13 : vector<8x32xf32>
    %15 = vector.extract_strided_slice %5 {offsets = [0, 64], sizes = [8, 32], strides = [1, 1]} : vector<8x128xf32> to vector<8x32xf32>
    %cst_7 = arith.constant dense<0xFF800000> : vector<8xf32>
    %16 = vector.multi_reduction <maximumf>, %15, %cst_7 [1] : vector<8x32xf32> to vector<8xf32>
    %17 = vector.shape_cast %16 : vector<8xf32> to vector<8x1xf32>
    %18 = vector.broadcast %17 : vector<8x1xf32> to vector<8x32xf32>
    %19 = arith.subf %15, %18 : vector<8x32xf32>
    %20 = math.exp %19 : vector<8x32xf32>
    %cst_8 = arith.constant dense<0.000000e+00> : vector<8xf32>
    %21 = vector.multi_reduction <add>, %20, %cst_8 [1] : vector<8x32xf32> to vector<8xf32>
    %22 = vector.shape_cast %21 : vector<8xf32> to vector<8x1xf32>
    %23 = tpu.reciprocal %22 {approx = true} : vector<8x1xf32> -> vector<8x1xf32>
    %24 = vector.broadcast %23 : vector<8x1xf32> to vector<8x32xf32>
    %25 = arith.mulf %20, %24 : vector<8x32xf32>
    %cst_9 = arith.constant 0.000000e+00 : f32
    %26 = vector.broadcast %cst_9 : f32 to vector<8x32xf32>
    %27 = tpu.concatenate %8, %14, %25, %26 in 1 : vector<8x32xf32>, vector<8x32xf32>, vector<8x32xf32>, vector<8x32xf32> -> vector<8x128xf32>
    %c0_10 = arith.constant 0 : index
    %c0_11 = arith.constant 0 : index
    %28 = vector.load %arg3[%c0_10, %c0_11] : memref<8x128xf32, #tpu.memory_space<vmem>>, vector<8x128xf32>
    tpu.vector_store %arg3[%c0_10, %c0_11], %27 {strides = array<i32>} : memref<8x128xf32, #tpu.memory_space<vmem>>, vector<8x128xf32>,
    return
  }
}

</mosaic_0001>

<bundles_post_ra>
// kernel: tpu_custom_call.1
= control target key start
LH: loop header
LB: loop body
LE: loop exit
PB: predicated region body
PF: predicated region fallthrough
CT: control target
= control target key end

     0   :  { %8 = vsyncpa [#allocation3], 0  ;;  %s316_s0 = inlined_call_operand.hbm [shape: f32[8,32], index: 0, kind: input, shape index: {}]   ;;  %s317_s1 = inlined_call_operand.hbm [shape: f32[32,128], index: 1, kind: input, shape index: {}]   ;;  %s318_s2 = inlined_call_operand.vmem [shape: f32[1,128], index: 2, kind: input, shape index: {}]   ;;  %s319_s3 = inlined_call_operand.hbm [shape: f32[8,128], index: 3, kind: output, shape index: {}]  }
   0x1   :  { %9 = vsyncpa [#allocation6], 0 }
   0x2   :  { %10 = vsyncpa [#allocation4], 0  ;;  %s273_s12 = smov [#allocation2]   ;;  %s274_s14 = smov [#allocation5]  }
   0x3   :  { %s17_s13 = sshll.u32 %s273_s12, 4  ;;  %s26_s15 = sshll.u32 %s274_s14, 4  ;;  %s18_s13 = int_to_ptr.vmem [resolvable:$true] %s17_s13  ;;  %s27_s15 = int_to_ptr.vmem [resolvable:$true] %s26_s15 }
   0x4   :  { %s215_s16 = scalar_lea.vmem %s18_s13, 128  ;;  %p220_p1 = scmp.lt.s32.totalorder %s18_s13, %s18_s13 }
   0x5   :  { %p216_p0 = scmp.ne.s32.totalorder %s18_s13, %s215_s16  ;;  %p221_p2 = scmp.lt.s32.totalorder %s215_s16, %s215_s16 }
   0x7   :  { %p222_p3 = por %p221_p2, %p220_p1 }
   0x9   :  { %p223_p4 = pnand %p222_p3, %p216_p0 }
   0xb   :  { %226 = shalt.err (!%p223_p4)
}
   0xc   :  { %20 = dma.hbm_to_vmem [thread:$0]  %s316_s0, 128, %s18_s13, [#allocation3]  }
   0xd   :  { %s235_s19 = scalar_lea.vmem %s27_s15, 512  ;;  %p240_p6 = scmp.lt.s32.totalorder %s27_s15, %s27_s15 }
   0xe   :  { %p236_p5 = scmp.ne.s32.totalorder %s27_s15, %s235_s19  ;;  %p241_p7 = scmp.lt.s32.totalorder %s235_s19, %s235_s19 }
  0x10   :  { %p242_p8 = por %p241_p7, %p240_p6 }
  0x12   :  { %p243_p9 = pnand %p242_p8, %p236_p5 }
  0x14   :  { %246 = shalt.err (!%p243_p9)
}
  0x15   :  { %s275_s20 = smov 128   ;;  %s276_s21 = smov 8  }
  0x16   :  { %32 = dma.hbm_to_vmem [thread:$0]  %s317_s1, 512, %s27_s15, [#allocation6], %s275_s20, %s275_s20, %s276_s21  }
  0x17   :  { %267 = dma.done.wait [#allocation3], 128  }
  0x18   :  { %268 = vsyncadd [#allocation3], 4294967168 }
  0x19   :  { %269 = dma.done.wait [#allocation6], 512  }
  0x1a   :  { %270 = vsyncadd [#allocation6], 4294966784  ;;  %v277_v0 = vmov 0.0   ;;  %vm278_vm0 = vmmov 0   ;;  %v45_v1 = vld [vmem:[#allocation5 + $0x18] sm:$0xff]  ;;  %v44_v2 = vld [vmem:[#allocation5 + $0x10] sm:$0xff] }
  0x1b   :  { %180 = vmatprep.subr.mxu0 %v277_v0  ;;  %188 = vmatprep.mubr.msk.f32.mxu0 %vm278_vm0, %v277_v0  ;;  %v43_v3 = vld [vmem:[#allocation5 + $0x8] sm:$0xff]  ;;  %v42_v4 = vld [vmem:[#allocation5] sm:$0xff]  ;;  %v41_v5 = vld [vmem:[#allocation2] sm:$0xff]  ;;  %vm53_vm1 = vcmask 261120   ;;  %vm134_vm2 = vcmask 785920   ;;  %s279_s24 = smov 64  }
  0x1c   :  { %181 = vmatpush3.msra.mxu0 %v45_v1  ;;  %v172_v6 = vld [vmem:[%s318_s2] ss:$0 sm:$0xff]  ;;  %vm151_vm3 = vcmask 523264   ;;  %s280_s2 = smov [#allocation7]   ;;  %vm153_vm4 = vcmask 785408  }
  0x1d   :  { %182 = vmatprep.subr.mxu0 %v277_v0  ;;  %s162_s25 = sshll.u32 %s280_s2, 4  ;;  %s163_s25 = int_to_ptr.vmem [resolvable:$true] %s162_s25 }
  0x1e   :  { %183 = vmatpush3.msra.mxu0 %v44_v2  ;;  %s247_s26 = scalar_lea.vmem %s163_s25, 128  ;;  %p252_p11 = scmp.lt.s32.totalorder %s163_s25, %s163_s25 }
  0x1f   :  { %184 = vmatprep.subr.mxu0 %v277_v0  ;;  %p248_p10 = scmp.ne.s32.totalorder %s163_s25, %s247_s26  ;;  %p253_p12 = scmp.lt.s32.totalorder %s247_s26, %s247_s26 }
  0x20   :  { %185 = vmatpush3.msra.mxu0 %v43_v3 }
  0x21   :  { %186 = vmatprep.subr.mxu0 %v277_v0  ;;  %p254_p13 = por %p253_p12, %p252_p11 }
  0x22   :  { %187 = vmatpush3.msra.mxu0 %v42_v4 }
  0x23   :  { %189 = vmatmul.mubr.msk.f32.vlgmr.msra.gmra.mxu0 %vm53_vm1, %v41_v5  ;;  %p255_p0 = pnand %p254_p13, %p248_p10 }
  0xe3   :  { %v123_v7 = vpop.f32.mrf.mxu0 }
  0xe4   :  { %v124_v8 = vadd.f32 %v172_v6, %v123_v7 }
  0xe5   :  { %v190_v9 = vpop.f32.mrf.mxu0 }
  0xe6   :  { %v135_v10 = vsel %vm134_vm2, %v124_v8, -inf  ;;  %v174_v17 = vmul.f32 -1.442695, %v124_v8  ;;  %v127_v23 = vmax.f32 %v124_v8, 0.0 }
  0xe7   :  { %136 = vmax.xlane.f32.xlu0 %v135_v10 }
 0x170   :  { %v137_v11 = vpop.xlane.xlu0 %136 }
 0x171   :  { %v138_v12 = vsub.f32 %v124_v8, %v137_v11 }
 0x173   :  { %v139_v13 = vmul.f32 1.442695, %v138_v12 }
 0x175   :  { %199 = vpow2.f32 %v139_v13 }
 0x176   :  { %201 = vpow2.f32 %v174_v17 }
 0x182   :  { %v200_v14 = vpop.eup %199 }
 0x183   :  { %142 = vrot.lane.b32.xlu0 %v200_v14, %s279_s24  ;;  %v202_v18 = vpop.eup %201 }
 0x184   :  { %v131_v19 = vadd.f32 1.0, %v202_v18 }
 0x186   :  { %203 = vrcp.f32 %v131_v19 }
 0x193   :  { %v204_v21 = vpop.eup %203 }
 0x194   :  { %v150_v25 = vsel %vm53_vm1, %v127_v23, %v204_v21 }
 0x1f5   :  { %v143_v15 = vpop.permute.xlu0 %142 }
 0x1f6   :  { %v145_v16 = vsel %vm53_vm1, %v143_v15, 0.0 }
 0x1f7   :  { %146 = vadd.xlane.f32.xlu1 %v145_v16 }
 0x280   :  { %v147_v20 = vpop.xlane.xlu1 %146 }
 0x281   :  { %205 = vrcp.f32 %v147_v20 }
 0x28e   :  { %v206_v22 = vpop.eup %205 }
 0x28f   :  { %v149_v24 = vmul.f32 %v206_v22, %v200_v14 }
 0x291   :  { %v152_v26 = vsel %vm151_vm3, %v150_v25, %v149_v24 }
 0x292   :  { %v154_v27 = vsel %vm153_vm4, %v152_v26, 0.0 }
 0x293   :  { %155 = vst [vmem:[#allocation7] sm:$0xff] %v154_v27 }
 0x294   :  { %258 = shalt.err (!%p255_p0)
}
 0x295   :  { %165 = dma.vmem_to_hbm [thread:$0]  %s163_s25, 128, %s319_s3, [#allocation4]  }
 0x296   :  { %271 = dma.done.wait [#allocation4], 128  }
 0x297   :  { %272 = vsyncadd [#allocation4], 4294967168 }
 0x298   :  { %169 = vsyncpa [#allocation3], 1 }
 0x299   :  { %170 = vsyncpa [#allocation6], 1 }
 0x29a   :  { %171 = vsyncpa [#allocation4], 1 }

</bundles_post_ra>
